<compile_context>
chip_gen: v5e
topology: v5e:2x2
jax: 0.10.0
libtpu: 0.0.40
codegen_flags: <defaults>
</compile_context>

<pallas_src>
import functools

import jax
import jax.numpy as jnp
from jax.experimental import pallas as pl
from jax.experimental.pallas import tpu as pltpu


def _pool_kernel(x_ref, o_ref):
    """Pass 1: per-tile LayerNorm (over channels) + spatial sum of the normalized value z.

    gamma/beta are applied later in JAX (mean(z*g + b) == g*mean(z) + b), so only x is needed.
    One grid step = one (C, TH*W) tile; output is that tile's (C, 1) partial sum.
    """
    x = x_ref[0].astype(jnp.float32)                        # (C, THW)
    mean = jnp.mean(x, axis=0, keepdims=True)               # (1, THW)
    ex2 = jnp.mean(x * x, axis=0, keepdims=True)
    inv = jax.lax.rsqrt(ex2 - mean * mean + 1e-5)           # one-pass variance
    z = (x - mean) * inv
    o_ref[0, 0] = jnp.sum(z, axis=1, keepdims=True)         # (C, 1)


def _main_kernel(x_ref, halo_ref, y2_ref, p_ref, o_ref, *, W, THW, C):
    """Pass 2: LayerNorm + separable 3x3 depthwise conv + SE gating + residual, one row-tile.

    p_ref columns: 0=gamma, 1=beta, 2=conv bias, 3..11 = 3x3 taps (t = 3*ky + kx).
    halo_ref sublanes: [0:C] = ky=0 row-sum of the row above the tile, [C:2C] = ky=2 row-sum
    of the row below (both already LayerNormed and zeroed outside the image, built in JAX).
    """
    f32 = jnp.float32
    x = x_ref[0].astype(f32)                                 # (C, THW)
    gamma = p_ref[:, 0:1].astype(f32)
    beta = p_ref[:, 1:2].astype(f32)
    dwb = p_ref[:, 2:3].astype(f32)

    # ---- LayerNorm over channels (sublane axis), eps = 1e-5, one-pass mean/var ----
    mean = jnp.mean(x, axis=0, keepdims=True)
    ex2 = jnp.mean(x * x, axis=0, keepdims=True)
    inv = jax.lax.rsqrt(ex2 - mean * mean + 1e-5)
    xn = (x - mean) * inv * gamma + beta                     # (C, THW)

    # ---- boundary masks, built once and hoisted out of the tap math ----
    lane = jax.lax.broadcasted_iota(jnp.int32, (1, THW), 1)
    wpos = lane % W
    has_left = wpos > 0                                      # pixel has a w-1 neighbour
    has_right = wpos < (W - 1)                               # pixel has a w+1 neighbour
    is_row0 = lane < W                                       # first row of this tile
    is_rowl = lane >= (THW - W)                              # last row of this tile

    # ---- separable 3x3 stencil: 2 horizontal rolls + 3 row sums + 2 vertical rolls ----
    xl = jnp.where(has_left, pltpu.roll(xn, shift=1, axis=1), 0.0)          # value at w-1
    xr = jnp.where(has_right, pltpu.roll(xn, shift=THW - 1, axis=1), 0.0)   # value at w+1

    def row_sum(ky):
        return (xl * p_ref[:, 3 + 3 * ky:4 + 3 * ky].astype(f32)
                + xn * p_ref[:, 4 + 3 * ky:5 + 3 * ky].astype(f32)
                + xr * p_ref[:, 5 + 3 * ky:6 + 3 * ky].astype(f32))

    r0 = row_sum(0)      # ky=0 taps: contributes to the row below it
    r1 = row_sum(1)      # ky=1 taps: contributes to its own row
    r2 = row_sum(2)      # ky=2 taps: contributes to the row above it

    conv = (r1 + dwb
            + jnp.where(is_row0, 0.0, pltpu.roll(r0, shift=W, axis=1))
            + jnp.where(is_rowl, 0.0, pltpu.roll(r2, shift=THW - W, axis=1)))

    # ---- SE gating + residual ----
    se = xn * y2_ref[0].astype(f32)                          # (C, THW)
    out = conv * se + x
    o_ref[0] = out.astype(o_ref.dtype)

    # ---- cross-tile vertical halo: patch first / last row with neighbour contributions ----
    halo = halo_ref[0, 0].astype(f32)                        # (2C, W)
    r0_top = halo[0:C, :]                                    # ky=0 row-sum of the row above
    r2_bot = halo[C:2 * C, :]                                # ky=2 row-sum of the row below
    o_ref[0, :, 0:W] = (out[:, 0:W] + r0_top * se[:, 0:W]).astype(o_ref.dtype)
    o_ref[0, :, THW - W:THW] = (out[:, THW - W:THW]
                                + r2_bot * se[:, THW - W:THW]).astype(o_ref.dtype)


def _pick_tile_rows(H, W, C, max_tile_bytes):
    """Largest TH dividing H with (TH*W) % 128 == 0 (lane-dense) that fits the byte budget."""
    divisors = [d for d in range(H, 0, -1) if H % d == 0]
    valid = [d for d in divisors if (d * W) % 128 == 0 and (d >= 2 or H == 1)]
    if not valid:
        # TODO(synk): pad W (or the flattened H*W) to a multiple of 128 for ragged image sizes.
        raise ValueError(f"no row tile with (TH*W) % 128 == 0 for H={H}, W={W}")
    fitting = [d for d in valid if C * d * W * 4 <= max_tile_bytes]
    return max(fitting) if fitting else min(valid)


def _vmem_limit_bytes():
    try:
        cap = pltpu.get_tpu_info().vmem_capacity_bytes       # 64 MiB on v7x, 128 MiB on v5e/v6e
    except Exception:
        cap = 128 * 1024 * 1024
    return max(16 * 1024 * 1024, min(int(cap * 0.7), 96 * 1024 * 1024))


def msef_block(x_nchw, params, *, max_tile_bytes=2 * 1024 * 1024):
    B, C, H, W = x_nchw.shape
    HW = H * W
    TH = _pick_tile_rows(H, W, C, max_tile_bytes)
    T = H // TH
    THW = TH * W
    vmem_limit = _vmem_limit_bytes()

    f32 = jnp.float32
    gamma = params["gamma"].astype(f32)                      # (C,)
    beta = params["beta"].astype(f32)
    dww = params["dw_w"][:, 0].reshape(C, 9).astype(f32)     # tap t = 3*ky + kx
    dwb = params["dw_b"].astype(f32)

    x3 = x_nchw.reshape(B, C, HW)                            # contiguous view, no transpose

    # ---------- pass 1: per-tile partial sums of the normalized activation ----------
    partial = pl.pallas_call(
        _pool_kernel,
        out_shape=jax.ShapeDtypeStruct((B, T, C, 1), f32),
        grid_spec=pltpu.PrefetchScalarGridSpec(
            num_scalar_prefetch=0,
            grid=(B, T),
            in_specs=[pl.BlockSpec((1, C, THW), lambda b, t: (b, 0, t))],
            out_specs=pl.BlockSpec((1, 1, C, 1), lambda b, t: (b, t, 0, 0)),
        ),
        compiler_params=pltpu.CompilerParams(
            dimension_semantics=("parallel", "parallel"),
            vmem_limit_bytes=vmem_limit),
    )(x3)

    # ---------- SE squeeze/excite FCs (tiny) in plain JAX ----------
    pool = partial[..., 0].sum(axis=1) / HW                  # (B, C): spatial mean of z
    pool = pool * gamma + beta                               # == spatial mean of x_norm
    y1 = jax.nn.relu(pool @ params["w1"].T.astype(f32) + params["b1"].astype(f32))
    y2 = jnp.tanh(y1 @ params["w2"].T.astype(f32) + params["b2"].astype(f32))   # (B, C)
    y2 = y2[:, :, None]                                      # (B, C, 1)

    # ---------- halo: pre-normalized neighbour-row conv contributions (2 rows / tile) ----------
    xf = x_nchw.astype(f32)
    t_idx = jnp.arange(T)
    top_rows = t_idx * TH - 1                                # row above each tile (-1 -> outside)
    bot_rows = t_idx * TH + TH                               # row below each tile (H -> outside)

    def ln_rows(rows, valid):
        xrows = xf[:, :, jnp.clip(rows, 0, H - 1), :]        # (B, C, T, W)
        m = xrows.mean(axis=1, keepdims=True)
        v = ((xrows - m) ** 2).mean(axis=1, keepdims=True)
        xn = (xrows - m) * jax.lax.rsqrt(v + 1e-5)
        xn = xn * gamma[None, :, None, None] + beta[None, :, None, None]
        return xn * valid[None, None, :, None]               # zero rows outside the image

    def row_contrib(xn_rows, taps):                          # taps: (C, 3) = one ky row of weights
        left = jnp.pad(xn_rows, ((0, 0), (0, 0), (0, 0), (1, 0)))[..., :W]     # value at w-1
        right = jnp.pad(xn_rows, ((0, 0), (0, 0), (0, 0), (0, 1)))[..., 1:]    # value at w+1
        return (left * taps[None, :, None, 0:1] + xn_rows * taps[None, :, None, 1:2]
                + right * taps[None, :, None, 2:3])

    r0_top = row_contrib(ln_rows(top_rows, (top_rows >= 0).astype(f32)), dww[:, 0:3])
    r2_bot = row_contrib(ln_rows(bot_rows, (bot_rows < H).astype(f32)), dww[:, 6:9])
    halo = jnp.concatenate([jnp.transpose(r0_top, (0, 2, 1, 3)),
                            jnp.transpose(r2_bot, (0, 2, 1, 3))], axis=2)       # (B, T, 2C, W)

    # ---------- packed per-channel params: [gamma, beta, conv bias, 9 taps] ----------
    pk = jnp.concatenate([gamma[:, None], beta[:, None], dwb[:, None], dww], axis=1)  # (C, 12)

    # ---------- pass 2: LN + separable depthwise 3x3 + SE gate + residual ----------
    # TODO(synk): for tiny images (T == 1, tile << 1 MiB) batch several images per grid step
    # (block (Bt, C, THW)) to amortize per-step overhead; on v5e add pipeline_mode=pl.Buffered(3)
    # on the x/out specs if the trace shows exposed DMA.
    kernel = functools.partial(_main_kernel, W=W, THW=THW, C=C)
    out = pl.pallas_call(
        kernel,
        out_shape=jax.ShapeDtypeStruct((B, C, HW), x_nchw.dtype),
        grid_spec=pltpu.PrefetchScalarGridSpec(
            num_scalar_prefetch=0,
            grid=(B, T),
            in_specs=[
                pl.BlockSpec((1, C, THW), lambda b, t: (b, 0, t)),          # x row-tile
                pl.BlockSpec((1, 1, 2 * C, W), lambda b, t: (b, t, 0, 0)),  # halo contributions
                pl.BlockSpec((1, C, 1), lambda b, t: (b, 0, 0)),            # SE gate y2
                pl.BlockSpec((C, 12), lambda b, t: (0, 0)),                 # packed params
            ],
            out_specs=pl.BlockSpec((1, C, THW), lambda b, t: (b, 0, t)),
        ),
        compiler_params=pltpu.CompilerParams(
            dimension_semantics=("parallel", "parallel"),
            vmem_limit_bytes=vmem_limit),
    )(x3, halo, y2, pk)
    return out.reshape(B, C, H, W)


def init_params(key, C):
    """Deterministic parameter init matching the module's __init__ shapes.
    Kaiming-uniform (relu gain, fan_in) bounds, biases zero, LayerNorm gamma=1/beta=0."""
    Ch = C // 16
    k1, k2, k3 = jax.random.split(key, 3)

    def bound(fan_in):
        return (2.0 ** 0.5) * (3.0 / fan_in) ** 0.5

    dw_w = jax.random.uniform(k1, (C, 1, 3, 3), jnp.float32, -bound(9), bound(9))
    w1 = jax.random.uniform(k2, (Ch, C), jnp.float32, -bound(C), bound(C))
    w2 = jax.random.uniform(k3, (C, Ch), jnp.float32, -bound(Ch), bound(Ch))
    return dict(
        gamma=jnp.ones((C,), jnp.float32),
        beta=jnp.zeros((C,), jnp.float32),
        dw_w=dw_w,
        dw_b=jnp.zeros((C,), jnp.float32),
        w1=w1,
        b1=jnp.zeros((Ch,), jnp.float32),
        w2=w2,
        b2=jnp.zeros((C,), jnp.float32),
    )


def msef_block_ref(x_nchw, params):
    """Pure-JAX reference of the PyTorch forward (for verification)."""
    B, C, H, W = x_nchw.shape
    x = jnp.transpose(x_nchw, (0, 2, 3, 1))
    mean = x.mean(-1, keepdims=True)
    var = ((x - mean) ** 2).mean(-1, keepdims=True)
    xn = (x - mean) / jnp.sqrt(var + 1e-5) * params["gamma"] + params["beta"]
    xp = jnp.pad(xn, ((0, 0), (1, 1), (1, 1), (0, 0)))
    w = params["dw_w"][:, 0]                                 # (C, 3, 3)
    conv = jnp.zeros_like(xn)
    for ky in range(3):
        for kx in range(3):
            conv = conv + xp[:, ky:ky + H, kx:kx + W, :] * w[:, ky, kx]
    conv = conv + params["dw_b"]
    pool = xn.mean(axis=(1, 2))                              # (B, C)
    y1 = jax.nn.relu(pool @ params["w1"].T + params["b1"])
    y2 = jnp.tanh(y1 @ params["w2"].T + params["b2"])
    out = conv * (xn * y2[:, None, None, :]) + x
    return jnp.transpose(out, (0, 3, 1, 2))


if __name__ == "__main__":
    B, C, H, W = 2, 32, 16, 16                               # filters=32 so C//16 = 2
    key = jax.random.PRNGKey(0)
    kx, kp = jax.random.split(key)
    x = jax.random.normal(kx, (B, C, H, W), jnp.float32)
    params = init_params(kp, C)

    ref = msef_block_ref(x, params)

    out = jax.block_until_ready(msef_block(x, params))                      # TH=16 -> 1 tile/image
    out_tiled = jax.block_until_ready(
        msef_block(x, params, max_tile_bytes=16 * 1024))                    # TH=8 -> 2 tiles, halo path
    assert out.shape == (B, C, H, W)
    assert bool(jnp.allclose(out, ref, atol=1e-4, rtol=1e-4)), "mismatch (single-tile path)"
    assert bool(jnp.allclose(out_tiled, ref, atol=1e-4, rtol=1e-4)), "mismatch (row-tiled path)"
    print("KERNEL_OK")
</pallas_src>

<mosaic_0001>
module attributes {stable_mosaic.version = 11 : i64} {
  func.func @_pool_kernel(%arg0: i32, %arg1: i32, %arg2: memref<1x32x256xf32, #tpu.memory_space<vmem>>, %arg3: memref<1x1x32x1xf32, #tpu.memory_space<vmem>>) attributes {dimension_semantics = [#tpu.dimension_semantics<parallel>, #tpu.dimension_semantics<parallel>], iteration_bounds = array<i64: 2, 1>, scalar_prefetch = 0 : i64, scratch_operands = 0 : i64, tpu.core_type = #tpu.core_type<tc>, window_params = [{transform_indices = @transform_0, window_bounds = array<i64: 1, 32, 256>}, {transform_indices = @transform_1, window_bounds = array<i64: 1, 1, 32, 1>}]} {
    %c0 = arith.constant 0 : index
    %c0_0 = arith.constant 0 : index
    %c0_1 = arith.constant 0 : index
    %0 = vector.load %arg2[%c0, %c0_0, %c0_1] : memref<1x32x256xf32, #tpu.memory_space<vmem>>, vector<1x32x256xf32>
    %1 = vector.shape_cast %0 : vector<1x32x256xf32> to vector<32x256xf32>
    %cst = arith.constant dense<0.000000e+00> : vector<256xf32>
    %2 = vector.multi_reduction <add>, %1, %cst [0] : vector<32x256xf32> to vector<256xf32>
    %3 = vector.shape_cast %2 : vector<256xf32> to vector<1x256xf32>
    %cst_2 = arith.constant 3.200000e+01 : f32
    %4 = vector.broadcast %cst_2 : f32 to vector<1x256xf32>
    %5 = arith.divf %3, %4 : vector<1x256xf32>
    %6 = arith.mulf %1, %1 : vector<32x256xf32>
    %cst_3 = arith.constant dense<0.000000e+00> : vector<256xf32>
    %7 = vector.multi_reduction <add>, %6, %cst_3 [0] : vector<32x256xf32> to vector<256xf32>
    %8 = vector.shape_cast %7 : vector<256xf32> to vector<1x256xf32>
    %cst_4 = arith.constant 3.200000e+01 : f32
    %9 = vector.broadcast %cst_4 : f32 to vector<1x256xf32>
    %10 = arith.divf %8, %9 : vector<1x256xf32>
    %11 = arith.mulf %5, %5 : vector<1x256xf32>
    %12 = arith.subf %10, %11 : vector<1x256xf32>
    %cst_5 = arith.constant 9.99999974E-6 : f32
    %13 = vector.broadcast %cst_5 : f32 to vector<1x256xf32>
    %14 = arith.addf %12, %13 : vector<1x256xf32>
    %15 = math.rsqrt %14 : vector<1x256xf32>
    %16 = vector.broadcast %5 : vector<1x256xf32> to vector<32x256xf32>
    %17 = arith.subf %1, %16 : vector<32x256xf32>
    %18 = vector.broadcast %15 : vector<1x256xf32> to vector<32x256xf32>
    %19 = arith.mulf %17, %18 : vector<32x256xf32>
    %cst_6 = arith.constant dense<0.000000e+00> : vector<32xf32>
    %20 = vector.multi_reduction <add>, %19, %cst_6 [1] : vector<32x256xf32> to vector<32xf32>
    %21 = vector.shape_cast %20 : vector<32xf32> to vector<32x1xf32>
    %c0_7 = arith.constant 0 : index
    %c0_8 = arith.constant 0 : index
    %c0_9 = arith.constant 0 : index
    %c0_10 = arith.constant 0 : index
    %22 = vector.load %arg3[%c0_7, %c0_8, %c0_9, %c0_10] : memref<1x1x32x1xf32, #tpu.memory_space<vmem>>, vector<1x1x32x1xf32>
    %23 = vector.shape_cast %22 : vector<1x1x32x1xf32> to vector<32x1xf32>
    %24 = vector.shape_cast %21 : vector<32x1xf32> to vector<1x1x32x1xf32>
    tpu.vector_store %arg3[%c0_7, %c0_8, %c0_9, %c0_10], %24 {strides = array<i32>} : memref<1x1x32x1xf32, #tpu.memory_space<vmem>>, vector<1x1x32x1xf32>,
    return
  }
  func.func @transform_0(%arg0: i32, %arg1: i32) -> (i32, i32, i32) {
    %c0_i32 = arith.constant 0 : i32
    %c0_i32_0 = arith.constant 0 : i32
    return %arg0, %c0_i32, %arg1 : i32, i32, i32
  }
  func.func @transform_1(%arg0: i32, %arg1: i32) -> (i32, i32, i32, i32) {
    %c0_i32 = arith.constant 0 : i32
    %c0_i32_0 = arith.constant 0 : i32
    %c0_i32_1 = arith.constant 0 : i32
    return %arg0, %arg1, %c0_i32, %c0_i32_0 : i32, i32, i32, i32
  }
}

</mosaic_0001>

<bundles_post_ra>
// kernel: tpu_custom_call.1
= control target key start
LH: loop header
LB: loop body
LE: loop exit
PB: predicated region body
PF: predicated region fallthrough
CT: control target
= control target key end

     0   :  { %6 = vsyncpa [#allocation3], 0  ;;  %s696_s0 = inlined_call_operand.hbm [shape: f32[2,32,256], index: 0, kind: input, shape index: {}]   ;;  %s697_s1 = inlined_call_operand.vmem [shape: f32[2,1,32,1], index: 1, kind: output, shape index: {}]  }
   0x1   :  { %8 = vsyncpa [#allocation3 + $0x1], 0  ;;  %s560_s6 = smov 0   ;;  %s562_s7 = smov 0  }
   0x2   :  { %s564_s8 = smov 0   ;;  %s566_s9 = smov 0  }
   0x3   :  { %s568_s10 = smov 0   ;;  %s570_s11 = smov 0  }
   0x4 LB: > { %s386_s12 = sadd.s32 4294967295, %s545_s11   ;;  %s26_s13 = sadd.s32 1, %s541_s10  ;;  %s545_s11 = sphi %s570_s11, %s14_s11   ;;  %s541_s10 = sphi %s568_s10, %s704_s10   ;;  %s537_s9 = sphi %s566_s9, %s703_s9   ;;  %s533_s8 = sphi %s564_s8, %s702_s8   ;;  %s529_s7 = sphi %s562_s7, %s701_s7   ;;  %s525_s6 = sphi %s560_s6, %s700_s6  }
   0x5   : > { %p28_p0 = scmp.ge.s32.totalorder %s26_s13, 2  ;;  %s35_s14 = sadd.s32 1, %s533_s8 }
   0x6   : > { %p42_p1 = scmp.ne.s32.totalorder %s533_s8, %s529_s7  ;;  %p43_p2 = scmp.eq.s32.totalorder %s545_s11, 0 }
   0x7   : > { %s706_s13 = smov (%p28_p0, %s26_s13), 0  ;;  %p48_p4 = scmp.ne.s32.totalorder %s529_s7, %s525_s6 }
   0x8   : > { %p596_p3 = por %p43_p2, %p42_p1  ;;  %s30_s16 = ssub.s32 %s541_s10, %s706_s13 }
   0x9   : > { %p49_p5 = scmp.eq.s32.totalorder %s386_s12, 0  ;;  %p33_p6 = scmp.eq.s32.totalorder %s30_s16, 0 }
   0xa   : > { %p407_p8 = scmp.lt.s32.totalorder %s545_s11, 2  ;;  %s100_s19 = sand.u32 1, %s533_s8  }
   0xb   : > { %p603_p7 = por %p49_p5, %p48_p4  ;;  %s399_s20 = sshll.u32 %s541_s10, 6 }
   0xc   : > { %s609_s18 = scalar_select %p33_p6, %s533_s8, %s35_s14  }
   0xd   : > { %s390_s21 = sshll.u32 %s100_s19, 6  ;;  %s111_s24 = scalar_lea.hbm %s696_s0, %s399_s20 }
   0xe   : > { %s112_s25 = sshll.u32 %s111_s24, 4  ;;  %s104_s26 = scalar_lea.vmem [#allocation2], %s390_s21  ;;  %s113_s25 = int_to_ptr.hbm [resolvable:$true] %s112_s25 }
   0xf   : > { %s114_s27 = sshll.u32 %s104_s26, 4  ;;  %p404_p9 = pnand %p407_p8, %p596_p3  ;;  %s115_s27 = int_to_ptr.vmem [resolvable:$true] %s114_s27 }
  0x10   : > { %p393_p10 = scmp.ge.s32.totalorder %s545_s11, 1  ;;  %p122_p11 = scmp.lt.s32.totalorder %s545_s11, 3 }
  0x11   : > { %s101_s28 = scalar_lea.sflag [#allocation3], %s100_s19  ;;  %s547_s29 = smov 256  }
  0x12   : > { %s548_s30 = smov 16   ;;  %p123_p12 = pnand %p393_p10, %p122_p11 }
  0x13   : > { %406 = dma.hbm_to_vmem [thread:$0]  (!%p404_p9), %s113_s25, 1024, %s115_s27, %s101_s28, %s547_s29, %s547_s29, %s548_s30  }
  0x14   : > { %126 = sbr.rel (%p123_p12) target bundleno = 203 (0xcb), region = 24  ;;  %s128_s2 = sand.u32 (!%p123_p12), 1, %s529_s7  }
  0x15   : > { %s394_s3 = sshll.u32 (!%p123_p12), %s128_s2, 6  ;;  %s129_s4 = scalar_lea.sflag (!%p123_p12), [#allocation3], %s128_s2 }
  0x16   : > { %s132_s5 = scalar_lea.vmem (!%p123_p12), [#allocation2], %s394_s3 }
  0x19   : > { %520 = dma.done.wait (%p603_p7), %s129_s4, 1024  }
  0x1a   : > { %522 = vsyncadd (%p603_p7), %s129_s4, 4294966272  ;;  %v549_v0 = vmov 32.0   ;;  %v625_v2 = vld [vmem:[%s132_s5] sm:$0xff]  ;;  %v627_v3 = vld [vmem:[%s132_s5 + $0x8] sm:$0xff]  ;;  %p157_p13 = scmp.lt.s32.totalorder %s537_s9, 1  ;;  %vm283_vm7 = vcmask 7168  }
  0x1b   : > { %459 = vrcp.f32 %v549_v0  ;;  %v629_v4 = vld [vmem:[%s132_s5 + $0x10] sm:$0xff]  ;;  %v631_v5 = vld [vmem:[%s132_s5 + $0x18] sm:$0xff]  ;;  %v633_v6 = vld [vmem:[%s132_s5 + $0x20] sm:$0xff]  ;;  %v201_v10 = vmul.f32 %v625_v2, %v625_v2  ;;  %v202_v14 = vmul.f32 %v627_v3, %v627_v3 }
  0x1c   : > { %v635_v7 = vld [vmem:[%s132_s5 + $0x28] sm:$0xff]  ;;  %v174_v8 = vadd.f32 %v629_v4, %v625_v2  ;;  %v641_v11 = vld [vmem:[%s132_s5 + $0x30] sm:$0xff]  ;;  %v643_v12 = vld [vmem:[%s132_s5 + $0x38] sm:$0xff]  ;;  %v183_v13 = vadd.f32 %v631_v5, %v627_v3  ;;  %v203_v15 = vmul.f32 %v629_v4, %v629_v4  ;;  %v204_v16 = vmul.f32 %v631_v5, %v631_v5  ;;  %s708_s9 = smov (!%p157_p13, %s537_s9), 1 }
  0x1d   : > { %v205_v18 = vmul.f32 %v633_v6, %v633_v6  ;;  %v206_v19 = vmul.f32 %v635_v7, %v635_v7  ;;  %v207_v22 = vmul.f32 %v641_v11, %v641_v11  ;;  %v208_v25 = vmul.f32 %v643_v12, %v643_v12  ;;  %s400_s6 = sshll.u32 %s708_s9, 5 }
  0x1e   : > { %v175_v17 = vadd.f32 %v174_v8, %v633_v6  ;;  %v184_v20 = vadd.f32 %v183_v13, %v635_v7  ;;  %v209_v23 = vadd.f32 %v203_v15, %v201_v10  ;;  %v218_v26 = vadd.f32 %v204_v16, %v202_v14  ;;  %s165_s15 = scalar_lea.vmem %s697_s1, %s400_s6 }
  0x20   : > { %v176_v24 = vadd.f32 %v175_v17, %v641_v11  ;;  %v185_v27 = vadd.f32 %v184_v20, %v643_v12  ;;  %v210_v28 = vadd.f32 %v209_v23, %v205_v18  ;;  %v219_v30 = vadd.f32 %v218_v26, %v206_v19 }
  0x21   : > { %v460_v1 = vpop.eup %459 }
  0x22   : > { %v193_v9 = vmul.f32 32.0, %v460_v1  ;;  %v177_v29 = vrot.slane %v176_v24, 4  ;;  %v186_v31 = vrot.slane %v185_v27, 4  ;;  %v211_v33 = vadd.f32 %v210_v28, %v207_v22 }
  0x23   : > { %v220_v35 = vadd.f32 %v219_v30, %v208_v25  ;;  %vm197_vm0 = vweird.f32 %v460_v1 }
  0x24   : > { %v194_v21 = vsub.f32 1.0, %v193_v9  ;;  %v178_v34 = vadd.f32 %v177_v29, %v176_v24  ;;  %v187_v36 = vadd.f32 %v186_v31, %v185_v27  ;;  %v212_v37 = vrot.slane %v211_v33, 4 }
  0x25   : > { %v221_v39 = vrot.slane %v220_v35, 4 }
  0x26   : > { %v195_v32 = vmul.f32 %v460_v1, %v194_v21  ;;  %v179_v38 = vrot.slane %v178_v34, 2  ;;  %v188_v40 = vrot.slane %v187_v36, 2  ;;  %v213_v42 = vadd.f32 %v212_v37, %v211_v33 }
  0x27   : > { %v222_v44 = vadd.f32 %v221_v39, %v220_v35 }
  0x28   : > { %v196_v41 = vadd.f32 %v460_v1, %v195_v32  ;;  %v180_v43 = vadd.f32 %v179_v38, %v178_v34  ;;  %v189_v45 = vadd.f32 %v188_v40, %v187_v36  ;;  %v214_v46 = vrot.slane %v213_v42, 2 }
  0x29   : > { %v223_v48 = vrot.slane %v222_v44, 2 }
  0x2a   : > { %v181_v47 = vrot.slane %v180_v43, 1  ;;  %v190_v49 = vrot.slane %v189_v45, 1  ;;  %v198_v50 = vsel %vm197_vm0, %v460_v1, %v196_v41  ;;  %v215_v51 = vadd.f32 %v214_v46, %v213_v42 }
  0x2b   : > { %v224_v53 = vadd.f32 %v223_v48, %v222_v44 }
  0x2c   : > { %v182_v52 = vadd.f32 %v181_v47, %v180_v43  ;;  %v191_v54 = vadd.f32 %v190_v49, %v189_v45  ;;  %v216_v55 = vrot.slane %v215_v51, 1 }
  0x2d   : > { %v225_v57 = vrot.slane %v224_v53, 1 }
  0x2e   : > { %v199_v56 = vmul.f32 %v198_v50, %v182_v52  ;;  %v200_v58 = vmul.f32 %v198_v50, %v191_v54  ;;  %v217_v59 = vadd.f32 %v216_v55, %v215_v51 }
  0x2f   : > { %v226_v60 = vadd.f32 %v225_v57, %v224_v53 }
  0x30   : > { %v229_v61 = vmul.f32 %v199_v56, %v199_v56  ;;  %v227_v62 = vmul.f32 %v217_v59, %v198_v50  ;;  %v230_v63 = vmul.f32 %v200_v58, %v200_v58  ;;  %v259_v23 = vsub.f32 %v633_v6, %v199_v56 }
  0x31   : > { %v228_v0 = vmul.f32 %v226_v60, %v198_v50  ;;  %v255_v24 = vsub.f32 %v625_v2, %v199_v56  ;;  %v260_v26 = vsub.f32 %v635_v7, %v200_v58  ;;  %v256_v27 = vsub.f32 %v627_v3, %v200_v58 }
  0x32   : > { %v231_v8 = vsub.f32 %v227_v62, %v229_v61  ;;  %v261_v30 = vsub.f32 %v641_v11, %v199_v56  ;;  %v262_v34 = vsub.f32 %v643_v12, %v200_v58  ;;  %v257_v2 = vsub.f32 %v629_v4, %v199_v56 }
  0x33   : > { %v232_v9 = vsub.f32 %v228_v0, %v230_v63  ;;  %v258_v36 = vsub.f32 %v631_v5, %v200_v58 }
  0x34   : > { %v233_v10 = vadd.f32 1e-05, %v231_v8 }
  0x35   : > { %v234_v13 = vadd.f32 1e-05, %v232_v9 }
  0x36   : > { %461 = vrsqrt.f32 %v233_v10  ;;  %vm241_vm1 = vweird.f32 %v233_v10 }
  0x37   : > { %463 = vrsqrt.f32 %v234_v13  ;;  %vm251_vm3 = vweird.f32 %v234_v13 }
  0x3c   : > { %v462_v1 = vpop.eup %461 }
  0x3d   : > { %v464_v14 = vpop.eup %463  ;;  %v236_v15 = vmul.f32 %v462_v1, %v233_v10  ;;  %vm242_vm2 = vweird.f32 %v462_v1 }
  0x3e   : > { %v246_v16 = vmul.f32 %v464_v14, %v234_v13  ;;  %vm252_vm4 = vweird.f32 %v464_v14  ;;  %vm243_vm5 = vmor %vm241_vm1, %vm242_vm2 }
  0x3f   : > { %v237_v17 = vmul.f32 %v462_v1, %v236_v15  ;;  %vm253_vm6 = vmor %vm251_vm3, %vm252_vm4 }
  0x40   : > { %v247_v18 = vmul.f32 %v464_v14, %v246_v16 }
  0x41   : > { %v238_v19 = vmul.f32 0.5, %v237_v17 }
  0x42   : > { %v248_v20 = vmul.f32 0.5, %v247_v18 }
  0x43   : > { %v239_v21 = vsub.f32 1.5, %v238_v19 }
  0x44   : > { %v249_v22 = vsub.f32 1.5, %v248_v20 }
  0x45   : > { %v240_v25 = vmul.f32 %v462_v1, %v239_v21 }
  0x46   : > { %v250_v28 = vmul.f32 %v464_v14, %v249_v22 }
  0x47   : > { %v244_v29 = vsel %vm243_vm5, %v462_v1, %v240_v25 }
  0x48   : > { %v254_v31 = vsel %vm253_vm6, %v464_v14, %v250_v28  ;;  %v267_v32 = vmul.f32 %v259_v23, %v244_v29  ;;  %v263_v33 = vmul.f32 %v255_v24, %v244_v29  ;;  %v269_v3 = vmul.f32 %v261_v30, %v244_v29 }
  0x49   : > { %v268_v35 = vmul.f32 %v260_v26, %v254_v31  ;;  %v264_v6 = vmul.f32 %v256_v27, %v254_v31  ;;  %v270_v38 = vmul.f32 %v262_v34, %v254_v31  ;;  %v265_v11 = vmul.f32 %v257_v2, %v244_v29 }
  0x4a   : > { %v266_v39 = vmul.f32 %v258_v36, %v254_v31 }
  0x4b   : > { %v277_v7 = vadd.f32 %v268_v35, %v267_v32  ;;  %v271_v37 = vadd.f32 %v264_v6, %v263_v33  ;;  %v280_v40 = vadd.f32 %v270_v38, %v269_v3 }
  0x4c   : > { %v274_v41 = vadd.f32 %v266_v39, %v265_v11 }
  0x4d   : > { %278 = vadd.xlane.f32.xlu1 %v277_v7  ;;  %272 = vadd.xlane.f32.xlu0 %v271_v37 }
  0x55   : > { %281 = vadd.xlane.f32.xlu1 %v280_v40  ;;  %275 = vadd.xlane.f32.xlu0 %v274_v41 }
  0xc0   : > { %v279_v4 = vpop.xlane.xlu1 %278  ;;  %v273_v5 = vpop.xlane.xlu0 %272 }
  0xc1   : > { %286 = vst.msk [vmem:[%s165_s15 + $0x10] sm:$0xff] %vm283_vm7, %v279_v4 }
  0xc2   : > { %284 = vst.msk [vmem:[%s165_s15] sm:$0xff] %vm283_vm7, %v273_v5 }
  0xc8   : > { %v282_v12 = vpop.xlane.xlu1 %281  ;;  %v276_v42 = vpop.xlane.xlu0 %275 }
  0xc9   : > { %287 = vst.msk [vmem:[%s165_s15 + $0x18] sm:$0xff] %vm283_vm7, %v282_v12 }
  0xca   : > { %285 = vst.msk [vmem:[%s165_s15 + $0x8] sm:$0xff] %vm283_vm7, %v276_v42 }
  0xcb PF: > { %s14_s11 = sadd.s32 1, %s545_s11   ;;  %s700_s6 = smov %s529_s7 }
  0xcc   : > { %p11_p0 = scmp.ge.s32.totalorder %s14_s11, 4   ;;  %s701_s7 = smov %s533_s8 }
  0xcd   : > { %s702_s8 = smov %s609_s18  ;;  %s703_s9 = smov %s541_s10 }
  0xce   : > { %s704_s10 = smov %s706_s13  ;;  %13 = sbr.rel (!%p11_p0) target bundleno = 4 (0x4), region = 64 }
  0xd3   :  { %317 = vsyncpa [#allocation3], 1 }
  0xd4   :  { %319 = vsyncpa [#allocation3 + $0x1], 1 }

</bundles_post_ra>
